<compile_context>
chip_gen: v7x
topology: tpu7x:2x2x1
jax: 0.10.0
libtpu: 0.0.40
codegen_flags: <defaults>
</compile_context>

<pallas_src>
import functools

import jax
import jax.numpy as jnp
from jax.experimental import pallas as pl
from jax.experimental.pallas import tpu as pltpu

EPS = 1e-12
MOMENTUM = 0.1

_LANE = 128
_SUBLANE_F32 = 8
_TARGET_BLOCK_BYTES = 4 << 20      # ~4 MiB f32-equivalent per input tile
_VMEM_LIMIT_BYTES = 48 << 20       # < 64 MiB v7x physical; well under v5e/v6e 128 MiB
_FUSED_MAX_BYTES = 4 << 20         # x (f32-equivalent) small enough for 1-block fused path


def _round_up(x, m):
    return ((x + m - 1) // m) * m


def _sublane_multiple(dtype):
    """Minimum second-to-last tile multiple for this dtype (8 f32, 16 bf16, 32 i8)."""
    itemsize = jnp.dtype(dtype).itemsize
    return max(_SUBLANE_F32, 32 // max(itemsize, 1))


def _pick_tiling(n_rows, d, sublane):
    """Balanced row tiling: pick num_tiles first, then tile_m, so padding is tiny."""
    row_bytes = d * 4  # size in f32 (in-kernel compute dtype) -- conservative
    cap = max(sublane, (_TARGET_BLOCK_BYTES // max(row_bytes, 1)) // sublane * sublane)
    num_tiles = pl.cdiv(n_rows, cap)
    # Megacore: >= 2 grid steps whenever there is enough work (v7x has 2 TCs).
    if num_tiles == 1 and n_rows > sublane:
        num_tiles = 2
    tile_m = _round_up(pl.cdiv(n_rows, num_tiles), sublane)
    num_tiles = pl.cdiv(n_rows, tile_m)
    rows_pad = num_tiles * tile_m
    return tile_m, num_tiles, rows_pad


# ---------------------------------------------------------------------------
# Kernel 1 (training only): per-tile partial sum of clamped row norms.
# Each grid step writes its scalar partial sum broadcast over a lane-dense
# (1, 8, 128) output block -> no resident accumulator, axis stays "parallel".
# ---------------------------------------------------------------------------
def _norm_partial_kernel(x_ref, psum_ref, *, eps):
    x = x_ref[...].astype(jnp.float32)                        # (tile_m, D)
    sq = jnp.sum(x * x, axis=-1, keepdims=True)               # (tile_m, 1)
    n = jnp.sqrt(jnp.maximum(sq, eps * eps))                  # == clamp(||x||, eps)
    psum_ref[...] = jnp.broadcast_to(jnp.sum(n), psum_ref.shape).astype(jnp.float32)


# ---------------------------------------------------------------------------
# Kernel 2: y = mean_scale * x / norm, norm recomputed from the VMEM tile
# (no (N,1) norms HBM round trip).  mean_scale is an SMEM scalar; the divide
# is per-row only.
# ---------------------------------------------------------------------------
def _scale_kernel(x_ref, mean_ref, o_ref, *, eps):
    x = x_ref[...].astype(jnp.float32)                        # (tile_m, D)
    sq = jnp.sum(x * x, axis=-1, keepdims=True)
    n = jnp.sqrt(jnp.maximum(sq, eps * eps))                  # (tile_m, 1)
    scale = mean_ref[0, 0] / n                                # per-row divide only
    o_ref[...] = (x * scale).astype(o_ref.dtype)


# ---------------------------------------------------------------------------
# Kernel 3 (training, x small): fused single pass.  x is read into VMEM once;
# norms, their mean, and the scaled output are all produced from the resident
# block.  HBM traffic: read x + write y (2x|x|) instead of 3x|x|.
# ---------------------------------------------------------------------------
def _fused_train_kernel(x_ref, o_ref, mean_ref, *, eps, inv_count):
    x = x_ref[...].astype(jnp.float32)                        # (N, D), N = all rows
    sq = jnp.sum(x * x, axis=-1, keepdims=True)
    n = jnp.sqrt(jnp.maximum(sq, eps * eps))
    m = jnp.sum(n) * inv_count                                # mean clamped norm
    o_ref[...] = (x * (m / n)).astype(o_ref.dtype)
    mean_ref[...] = jnp.broadcast_to(m, mean_ref.shape).astype(jnp.float32)


def _update_buffers(mean_scale, running_scale, num_batches_tracked, momentum):
    new_running = jnp.where(
        num_batches_tracked == 0,
        running_scale + mean_scale,
        running_scale * (1.0 - momentum) + mean_scale * momentum,
    )
    return new_running, num_batches_tracked + 1


def batch_l2_norm(x, running_scale, num_batches_tracked,
                  *, momentum=MOMENTUM, eps=EPS, training=True):
    """Pallas implementation of BatchL2Norm.forward.

    Returns (y, new_running_scale, new_num_batches_tracked).
    """
    orig_shape = x.shape
    d = int(orig_shape[-1])
    n_rows = 1
    for s in orig_shape[:-1]:
        n_rows *= int(s)

    x2 = x.reshape(n_rows, d)
    sublane = _sublane_multiple(x.dtype)

    # ---- fused single-pass path (training, x fits comfortably in VMEM) -----
    if training and n_rows * d * 4 <= _FUSED_MAX_BYTES:
        y2, mean_blk = pl.pallas_call(
            functools.partial(_fused_train_kernel, eps=eps, inv_count=1.0 / n_rows),
            out_shape=(jax.ShapeDtypeStruct((n_rows, d), x.dtype),
                       jax.ShapeDtypeStruct((_SUBLANE_F32, _LANE), jnp.float32)),
            grid_spec=pltpu.PrefetchScalarGridSpec(
                num_scalar_prefetch=0,
                grid=(1,),
                in_specs=[pl.BlockSpec((n_rows, d), lambda i: (0, 0))],
                out_specs=[pl.BlockSpec((n_rows, d), lambda i: (0, 0)),
                           pl.BlockSpec((_SUBLANE_F32, _LANE), lambda i: (0, 0))],
            ),
            compiler_params=pltpu.CompilerParams(
                dimension_semantics=("arbitrary",),
                vmem_limit_bytes=_VMEM_LIMIT_BYTES),
        )(x2)
        mean_scale = mean_blk[0, 0]
        new_running, new_tracked = _update_buffers(
            mean_scale, running_scale, num_batches_tracked, momentum)
        return y2.reshape(orig_shape), new_running, new_tracked

    # ---- tiled two-pass path ------------------------------------------------
    tile_m, num_tiles, rows_pad = _pick_tiling(n_rows, d, sublane)
    n_pad_rows = rows_pad - n_rows
    xp = x2 if n_pad_rows == 0 else jnp.pad(x2, ((0, n_pad_rows), (0, 0)))

    if training:
        # pass 1: partial sums of clamped row norms (parallel over row tiles)
        partials = pl.pallas_call(
            functools.partial(_norm_partial_kernel, eps=eps),
            out_shape=jax.ShapeDtypeStruct((num_tiles, _SUBLANE_F32, _LANE), jnp.float32),
            grid_spec=pltpu.PrefetchScalarGridSpec(
                num_scalar_prefetch=0,
                grid=(num_tiles,),
                in_specs=[pl.BlockSpec((tile_m, d), lambda i: (i, 0))],
                out_specs=pl.BlockSpec((1, _SUBLANE_F32, _LANE), lambda i: (i, 0, 0)),
            ),
            compiler_params=pltpu.CompilerParams(
                dimension_semantics=("parallel",),
                vmem_limit_bytes=_VMEM_LIMIT_BYTES),
        )(xp)
        # Padded (all-zero) rows each contribute exactly eps; subtract them.
        norm_sum = jnp.sum(partials[:, 0, 0]) - jnp.float32(n_pad_rows * eps)
        mean_scale = norm_sum / jnp.float32(n_rows)
        new_running, new_tracked = _update_buffers(
            mean_scale, running_scale, num_batches_tracked, momentum)
    else:
        # Eval: pass 1 is skipped entirely (mean_scale = running_scale).
        mean_scale = running_scale.reshape(()).astype(jnp.float32)
        new_running = running_scale
        new_tracked = num_batches_tracked

    mean_arr = jnp.asarray(mean_scale, jnp.float32).reshape(1, 1)

    # pass 2: y = mean_scale * x / norm (norm recomputed from the VMEM tile)
    yp = pl.pallas_call(
        functools.partial(_scale_kernel, eps=eps),
        out_shape=jax.ShapeDtypeStruct((rows_pad, d), x.dtype),
        grid_spec=pltpu.PrefetchScalarGridSpec(
            num_scalar_prefetch=0,
            grid=(num_tiles,),
            in_specs=[
                pl.BlockSpec((tile_m, d), lambda i: (i, 0)),
                pl.BlockSpec(memory_space=pltpu.MemorySpace.SMEM),
            ],
            out_specs=pl.BlockSpec((tile_m, d), lambda i: (i, 0)),
        ),
        compiler_params=pltpu.CompilerParams(
            dimension_semantics=("parallel",),
            vmem_limit_bytes=_VMEM_LIMIT_BYTES),
    )(xp, mean_arr)

    y2 = yp if n_pad_rows == 0 else yp[:n_rows]
    return y2.reshape(orig_shape), new_running, new_tracked


# ---------------------------------------------------------------------------
# Pure-JAX reference (mirrors the PyTorch module).
# ---------------------------------------------------------------------------
def _reference(x, running_scale, num_batches_tracked,
               momentum=MOMENTUM, eps=EPS, training=True):
    norm = jnp.maximum(jnp.linalg.norm(x, ord=2, axis=-1, keepdims=True), eps)
    if training:
        mean_scale = jnp.mean(norm)
        new_running = jnp.where(
            num_batches_tracked == 0,
            running_scale + mean_scale,
            running_scale * (1.0 - momentum) + mean_scale * momentum,
        )
        new_tracked = num_batches_tracked + 1
    else:
        mean_scale = running_scale
        new_running = running_scale
        new_tracked = num_batches_tracked
    return mean_scale * x / norm, new_running, new_tracked


if __name__ == "__main__":
    rs0 = jnp.zeros((1,), dtype=jnp.float32)
    nbt0 = jnp.array(0, dtype=jnp.int32)

    # 1) small f32, training -> fused single-pass path
    x1 = jax.random.normal(jax.random.PRNGKey(0), (2, 4, 16, 32), dtype=jnp.float32)
    y1, rs1, nbt1 = batch_l2_norm(x1, rs0, nbt0, training=True)
    y1 = jax.block_until_ready(y1)
    y1r, rs1r, nbt1r = _reference(x1, rs0, nbt0, training=True)
    assert jnp.allclose(y1, y1r, atol=1e-5, rtol=1e-5), "fused output mismatch"
    assert jnp.allclose(rs1, rs1r, atol=1e-5, rtol=1e-5), "fused running_scale mismatch"
    assert int(nbt1) == int(nbt1r), "fused num_batches_tracked mismatch"

    # 2) ragged shape (rows not a sublane multiple, D=40 unaligned), training
    x2 = jax.random.normal(jax.random.PRNGKey(1), (3, 5, 40), dtype=jnp.float32)
    y2, rs2, nbt2 = batch_l2_norm(x2, rs0, nbt0, training=True)
    y2 = jax.block_until_ready(y2)
    y2r, rs2r, nbt2r = _reference(x2, rs0, nbt0, training=True)
    assert jnp.allclose(y2, y2r, atol=1e-5, rtol=1e-5), "ragged output mismatch"
    assert jnp.allclose(rs2, rs2r, atol=1e-5, rtol=1e-5), "ragged running_scale mismatch"
    assert int(nbt2) == int(nbt2r), "ragged num_batches_tracked mismatch"

    # 3) eval mode -> pass 1 skipped, buffers unchanged
    rs_run = jnp.array([1.7], dtype=jnp.float32)
    nbt_run = jnp.array(3, dtype=jnp.int32)
    y3, rs3, nbt3 = batch_l2_norm(x1, rs_run, nbt_run, training=False)
    y3 = jax.block_until_ready(y3)
    y3r, rs3r, nbt3r = _reference(x1, rs_run, nbt_run, training=False)
    assert jnp.allclose(y3, y3r, atol=1e-5, rtol=1e-5), "eval output mismatch"
    assert jnp.allclose(rs3, rs3r, atol=1e-5, rtol=1e-5), "eval running_scale mismatch"
    assert int(nbt3) == int(nbt3r), "eval num_batches_tracked mismatch"

    # 4) larger f32, training -> two-pass tiled path (balanced row tiles, >=2 tiles)
    x4 = jax.random.normal(jax.random.PRNGKey(2), (512, 8, 512), dtype=jnp.float32)
    y4, rs4, nbt4 = batch_l2_norm(x4, rs0, nbt0, training=True)
    y4 = jax.block_until_ready(y4)
    y4r, rs4r, nbt4r = _reference(x4, rs0, nbt0, training=True)
    assert jnp.allclose(y4, y4r, atol=1e-4, rtol=1e-4), "tiled output mismatch"
    assert jnp.allclose(rs4, rs4r, atol=1e-4, rtol=1e-4), "tiled running_scale mismatch"
    assert int(nbt4) == int(nbt4r), "tiled num_batches_tracked mismatch"

    # 5) bf16 input, training -> dtype-aware (16-row) sublane tiling, tiled path
    x5 = jax.random.normal(jax.random.PRNGKey(3), (2048, 1024),
                           dtype=jnp.float32).astype(jnp.bfloat16)
    y5, rs5, nbt5 = batch_l2_norm(x5, rs0, nbt0, training=True)
    y5 = jax.block_until_ready(y5)
    y5r, rs5r, _ = _reference(x5.astype(jnp.float32), rs0, nbt0, training=True)
    assert jnp.allclose(y5.astype(jnp.float32), y5r, atol=2e-2, rtol=2e-2), \
        "bf16 output mismatch"
    assert jnp.allclose(rs5, rs5r, atol=1e-3, rtol=1e-3), "bf16 running_scale mismatch"

    print("KERNEL_OK")
</pallas_src>

<mosaic_0001>
module attributes {stable_mosaic.version = 11 : i64} {
  func.func @_fused_train_kernel(%arg0: i32, %arg1: memref<128x32xf32, #tpu.memory_space<vmem>>, %arg2: memref<128x32xf32, #tpu.memory_space<vmem>>, %arg3: memref<8x128xf32, #tpu.memory_space<vmem>>) attributes {dimension_semantics = [#tpu.dimension_semantics<arbitrary>], iteration_bounds = array<i64: 1>, scalar_prefetch = 0 : i64, scratch_operands = 0 : i64, tpu.core_type = #tpu.core_type<tc>, window_params = [{pipeline_mode = #tpu.pipeline_mode<synchronous>, transform_indices = @transform_0, window_bounds = array<i64: 128, 32>}, {pipeline_mode = #tpu.pipeline_mode<synchronous>, transform_indices = @transform_1, window_bounds = array<i64: 128, 32>}, {pipeline_mode = #tpu.pipeline_mode<synchronous>, transform_indices = @transform_2, window_bounds = array<i64: 8, 128>}]} {
    %c0 = arith.constant 0 : index
    %c0_0 = arith.constant 0 : index
    %0 = vector.load %arg1[%c0, %c0_0] : memref<128x32xf32, #tpu.memory_space<vmem>>, vector<128x32xf32>
    %1 = arith.mulf %0, %0 : vector<128x32xf32>
    %cst = arith.constant dense<0.000000e+00> : vector<128xf32>
    %2 = vector.multi_reduction <add>, %1, %cst [1] : vector<128x32xf32> to vector<128xf32>
    %3 = vector.shape_cast %2 : vector<128xf32> to vector<128x1xf32>
    %cst_1 = arith.constant 1.000000e-24 : f32
    %4 = vector.broadcast %cst_1 : f32 to vector<128x1xf32>
    %5 = arith.maximumf %3, %4 : vector<128x1xf32>
    %6 = math.sqrt %5 : vector<128x1xf32>
    %7 = vector.shape_cast %6 : vector<128x1xf32> to vector<1x128x1xf32>
    %cst_2 = arith.constant dense<0.000000e+00> : vector<1xf32>
    %8 = vector.multi_reduction <add>, %7, %cst_2 [1, 2] : vector<1x128x1xf32> to vector<1xf32>
    %9 = vector.shape_cast %8 : vector<1xf32> to vector<1x1x1xf32>
    %10 = vector.extract %9[0, 0, 0] : f32 from vector<1x1x1xf32>
    %cst_3 = arith.constant 7.812500e-03 : f32
    %11 = arith.mulf %10, %cst_3 : f32
    %12 = vector.broadcast %11 : f32 to vector<128x1xf32>
    %13 = arith.divf %12, %6 : vector<128x1xf32>
    %14 = vector.broadcast %13 : vector<128x1xf32> to vector<128x32xf32>
    %15 = arith.mulf %0, %14 : vector<128x32xf32>
    %c0_4 = arith.constant 0 : index
    %c0_5 = arith.constant 0 : index
    %16 = vector.load %arg2[%c0_4, %c0_5] : memref<128x32xf32, #tpu.memory_space<vmem>>, vector<128x32xf32>
    tpu.vector_store %arg2[%c0_4, %c0_5], %15 {strides = array<i32>} : memref<128x32xf32, #tpu.memory_space<vmem>>, vector<128x32xf32>,
    %17 = vector.broadcast %11 : f32 to vector<8x128xf32>
    %c0_6 = arith.constant 0 : index
    %c0_7 = arith.constant 0 : index
    %18 = vector.load %arg3[%c0_6, %c0_7] : memref<8x128xf32, #tpu.memory_space<vmem>>, vector<8x128xf32>
    tpu.vector_store %arg3[%c0_6, %c0_7], %17 {strides = array<i32>} : memref<8x128xf32, #tpu.memory_space<vmem>>, vector<8x128xf32>,
    return
  }
  func.func @transform_0(%arg0: i32) -> (i32, i32) {
    %c0_i32 = arith.constant 0 : i32
    %c0_i32_0 = arith.constant 0 : i32
    %c0_i32_1 = arith.constant 0 : i32
    return %c0_i32, %c0_i32_0 : i32, i32
  }
  func.func @transform_1(%arg0: i32) -> (i32, i32) {
    %c0_i32 = arith.constant 0 : i32
    %c0_i32_0 = arith.constant 0 : i32
    %c0_i32_1 = arith.constant 0 : i32
    return %c0_i32, %c0_i32_0 : i32, i32
  }
  func.func @transform_2(%arg0: i32) -> (i32, i32) {
    %c0_i32 = arith.constant 0 : i32
    %c0_i32_0 = arith.constant 0 : i32
    %c0_i32_1 = arith.constant 0 : i32
    return %c0_i32, %c0_i32_0 : i32, i32
  }
}

</mosaic_0001>

<bundles_post_ra>
// kernel: tpu_custom_call.1
= control target key start
LH: loop header
LB: loop body
LE: loop exit
PB: predicated region body
PF: predicated region fallthrough
CT: control target
= control target key end

     0   :  { %vm43_vm0 = vcmask 261120   ;;  %s841_s0 = inlined_call_operand.vmem [shape: f32[128,32], index: 0, kind: input, shape index: {}]   ;;  %s842_s1 = inlined_call_operand.vmem [shape: f32[128,32], index: 1, kind: output, shape index: {0}]   ;;  %s843_s2 = inlined_call_operand.hbm [shape: f32[8,128], index: 2, kind: output, shape index: {1}]  }
   0x1   :  { %v456_v0 = vld [vmem:[%s841_s0 + $0x10] sm:$0xff]  ;;  %v461_v1 = vld [vmem:[%s841_s0] sm:$0xff]  ;;  %v466_v2 = vld [vmem:[%s841_s0 + $0x18] sm:$0xff] }
   0x2   :  { %v29_v3 = vmul.f32 %v456_v0, %v456_v0  ;;  %v27_v4 = vmul.f32 %v461_v1, %v461_v1  ;;  %v30_v5 = vmul.f32 %v466_v2, %v466_v2  ;;  %v477_v6 = vld [vmem:[%s841_s0 + $0x8] sm:$0xff]  ;;  %v489_v9 = vld [vmem:[%s841_s0 + $0x20] sm:$0xff] }
   0x3   :  { %v28_v7 = vmul.f32 %v477_v6, %v477_v6  ;;  %v484_v8 = vld [vmem:[%s841_s0 + $0x28] sm:$0xff]  ;;  %v31_v15 = vmul.f32 %v489_v9, %v489_v9 }
   0x4   :  { %v50_v10 = vsel %vm43_vm0, %v29_v3, 0.0  ;;  %v44_v11 = vsel %vm43_vm0, %v27_v4, 0.0  ;;  %v53_v12 = vsel %vm43_vm0, %v30_v5, 0.0  ;;  %v32_v14 = vmul.f32 %v484_v8, %v484_v8 }
   0x5   :  { %51 = vadd.xlane.f32.xlu1 %v50_v10  ;;  %45 = vadd.xlane.f32.xlu0 %v44_v11  ;;  %v47_v13 = vsel %vm43_vm0, %v28_v7, 0.0 }
   0x6   :  { %8 = vsyncpa [#allocation3], 0  ;;  %v502_v16 = vld [vmem:[%s841_s0 + $0x38] sm:$0xff]  ;;  %v507_v17 = vld [vmem:[%s841_s0 + $0x30] sm:$0xff]  ;;  %v59_v18 = vsel %vm43_vm0, %v32_v14, 0.0  ;;  %v56_v19 = vsel %vm43_vm0, %v31_v15, 0.0 }
   0x7   :  { %v34_v20 = vmul.f32 %v502_v16, %v502_v16  ;;  %v33_v21 = vmul.f32 %v507_v17, %v507_v17  ;;  %v518_v22 = vld [vmem:[%s841_s0 + $0x48] sm:$0xff]  ;;  %v523_v23 = vld [vmem:[%s841_s0 + $0x40] sm:$0xff]  ;;  %v534_v28 = vld [vmem:[%s841_s0 + $0x58] sm:$0xff]  ;;  %vm220_vm2 = vcmask 7168  }
   0x8   :  { %v36_v26 = vmul.f32 %v518_v22, %v518_v22  ;;  %v35_v27 = vmul.f32 %v523_v23, %v523_v23  ;;  %v539_v29 = vld [vmem:[%s841_s0 + $0x50] sm:$0xff]  ;;  %v38_v32 = vmul.f32 %v534_v28, %v534_v28  ;;  %v550_v34 = vld [vmem:[%s841_s0 + $0x68] sm:$0xff]  ;;  %v555_v35 = vld [vmem:[%s841_s0 + $0x60] sm:$0xff] }
   0x9   :  { %54 = vadd.xlane.f32.xlu1 %v53_v12  ;;  %48 = vadd.xlane.f32.xlu0 %v47_v13  ;;  %v65_v24 = vsel %vm43_vm0, %v34_v20, 0.0  ;;  %v62_v25 = vsel %vm43_vm0, %v33_v21, 0.0  ;;  %v37_v33 = vmul.f32 %v539_v29, %v539_v29  ;;  %v40_v38 = vmul.f32 %v550_v34, %v550_v34  ;;  %v566_v40 = vld [vmem:[%s841_s0 + $0x78] sm:$0xff]  ;;  %v571_v41 = vld [vmem:[%s841_s0 + $0x70] sm:$0xff]  ;;  %s437_s0 = smov [#allocation2]  }
   0xa   :  { %v71_v30 = vsel %vm43_vm0, %v36_v26, 0.0  ;;  %v68_v31 = vsel %vm43_vm0, %v35_v27, 0.0  ;;  %v77_v36 = vsel %vm43_vm0, %v38_v32, 0.0  ;;  %v39_v39 = vmul.f32 %v555_v35, %v555_v35  ;;  %s336_s13 = sshll.u32 %s437_s0, 4  ;;  %s337_s13 = int_to_ptr.vmem [resolvable:$true] %s336_s13 }
   0xb   :  { %v74_v37 = vsel %vm43_vm0, %v37_v33, 0.0  ;;  %v83_v42 = vsel %vm43_vm0, %v40_v38, 0.0  ;;  %v42_v44 = vmul.f32 %v566_v40, %v566_v40  ;;  %v41_v45 = vmul.f32 %v571_v41, %v571_v41  ;;  %s413_s16 = scalar_lea.vmem %s337_s13, 128  ;;  %p418_p1 = scmp.lt.s32.totalorder %s337_s13, %s337_s13 }
   0xc   :  { %v80_v43 = vsel %vm43_vm0, %v39_v39, 0.0  ;;  %p414_p0 = scmp.ne.s32.totalorder %s337_s13, %s413_s16  ;;  %p419_p2 = scmp.lt.s32.totalorder %s413_s16, %s413_s16 }
   0xd   :  { %60 = vadd.xlane.f32.xlu1 %v59_v18  ;;  %57 = vadd.xlane.f32.xlu0 %v56_v19  ;;  %v89_v46 = vsel %vm43_vm0, %v42_v44, 0.0  ;;  %v86_v47 = vsel %vm43_vm0, %v41_v45, 0.0 }
   0xe   :  { %p420_p3 = por %p419_p2, %p418_p1 }
  0x10   :  { %p421_p4 = pnand %p420_p3, %p414_p0 }
  0x11   :  { %66 = vadd.xlane.f32.xlu1 %v65_v24  ;;  %63 = vadd.xlane.f32.xlu0 %v62_v25 }
  0x15   :  { %72 = vadd.xlane.f32.xlu1 %v71_v30  ;;  %69 = vadd.xlane.f32.xlu0 %v68_v31 }
  0x19   :  { %78 = vadd.xlane.f32.xlu1 %v77_v36  ;;  %75 = vadd.xlane.f32.xlu0 %v74_v37 }
  0x1d   :  { %84 = vadd.xlane.f32.xlu1 %v83_v42  ;;  %81 = vadd.xlane.f32.xlu0 %v80_v43 }
  0x21   :  { %90 = vadd.xlane.f32.xlu1 %v89_v46  ;;  %87 = vadd.xlane.f32.xlu0 %v86_v47 }
  0x92   :  { %v52_v48 = vpop.xlane.xlu1 %51  ;;  %v46_v49 = vpop.xlane.xlu0 %45 }
  0x93   :  { %v94_v50 = vmax.f32 %v52_v48, 1e-24  ;;  %v92_v51 = vmax.f32 %v46_v49, 1e-24 }
  0x95   :  { %349 = vrsqrt.f32 %v94_v50  ;;  %vm110_vm1 = vcmp.eq.f32.partialorder %v92_v51, inf  ;;  %vm124_vm3 = vcmp.eq.f32.partialorder %v94_v50, inf  ;;  %vm112_vm4 = vcmp.eq.f32.partialorder %v92_v51, 0.0 }
  0x96   :  { %351 = vrsqrt.f32 %v92_v51  ;;  %v55_v52 = vpop.xlane.xlu1 %54  ;;  %v49_v53 = vpop.xlane.xlu0 %48  ;;  %v113_v15 = vand.u32 2147483648, %v92_v51  ;;  %v127_v31 = vand.u32 2147483648, %v94_v50  ;;  %vm126_vm7 = vcmp.eq.f32.partialorder %v94_v50, 0.0 }
  0x97   :  { %v581_v54 = vmax.f32 %v55_v52, 1e-24  ;;  %v93_v55 = vmax.f32 %v49_v53, 1e-24 }
  0x99   :  { %353 = vrsqrt.f32 %v581_v54  ;;  %vm117_vm5 = vcmp.eq.f32.partialorder %v93_v55, inf  ;;  %v120_v19 = vand.u32 2147483648, %v93_v55  ;;  %vm119_vm6 = vcmp.eq.f32.partialorder %v93_v55, 0.0 }
  0x9a   :  { %355 = vrsqrt.f32 %v93_v55  ;;  %v61_v56 = vpop.xlane.xlu1 %60  ;;  %v58_v57 = vpop.xlane.xlu0 %57  ;;  %vm131_vm8 = vcmp.eq.f32.partialorder %v581_v54, inf  ;;  %v134_v48 = vand.u32 2147483648, %v581_v54  ;;  %vm133_vm9 = vcmp.eq.f32.partialorder %v581_v54, 0.0 }
  0x9b   :  { %v584_v58 = vmax.f32 %v58_v57, 1e-24  ;;  %v586_v59 = vmax.f32 %v61_v56, 1e-24 }
  0x9d   :  { %357 = vrsqrt.f32 %v584_v58  ;;  %vm138_vm10 = vcmp.eq.f32.partialorder %v584_v58, inf  ;;  %vm145_vm11 = vcmp.eq.f32.partialorder %v586_v59, inf  ;;  %vm140_vm12 = vcmp.eq.f32.partialorder %v584_v58, 0.0 }
  0x9e   :  { %v67_v60 = vpop.xlane.xlu1 %66  ;;  %v64_v61 = vpop.xlane.xlu0 %63  ;;  %359 = vrsqrt.f32 %v586_v59  ;;  %vm147_vm13 = vcmp.eq.f32.partialorder %v586_v59, 0.0 }
  0x9f   :  { %v350_v62 = vpop.eup %349  ;;  %v589_v63 = vmax.f32 %v64_v61, 1e-24  ;;  %v592_v5 = vmax.f32 %v67_v60, 1e-24 }
  0xa0   :  { %v352_v3 = vpop.eup %351  ;;  %v123_v7 = vmul.f32 %v350_v62, %v94_v50 }
  0xa1   :  { %v109_v4 = vmul.f32 %v352_v3, %v92_v51  ;;  %361 = vrsqrt.f32 %v589_v63  ;;  %vm159_vm14 = vcmp.eq.f32.partialorder %v592_v5, inf  ;;  %vm152_vm15 = vcmp.eq.f32.partialorder %v589_v63, inf }
  0xa2   :  { %v73_v10 = vpop.xlane.xlu1 %72  ;;  %v70_v11 = vpop.xlane.xlu0 %69  ;;  %363 = vrsqrt.f32 %v592_v5  ;;  %v125_v21 = vsel %vm124_vm3, %v94_v50, %v123_v7 }
  0xa3   :  { %v354_v12 = vpop.eup %353  ;;  %v111_v13 = vsel %vm110_vm1, %v92_v51, %v109_v4  ;;  %v596_v20 = vmax.f32 %v73_v10, 1e-24  ;;  %v601_v26 = vmax.f32 %v70_v11, 1e-24  ;;  %v606_v37 = vsel %vm126_vm7, %v127_v31, %v125_v21 }
  0xa4   :  { %v356_v14 = vpop.eup %355  ;;  %v598_v24 = vsel %vm112_vm4, %v113_v15, %v111_v13  ;;  %v130_v25 = vmul.f32 %v354_v12, %v581_v54  ;;  %v224_v49 = vsel %vm220_vm2, %v606_v37, 0.0  ;;  %vm154_vm1 = vcmp.eq.f32.partialorder %v589_v63, 0.0 }
  0xa5   :  { %v116_v18 = vmul.f32 %v356_v14, %v93_v55  ;;  %v221_v38 = vsel %vm220_vm2, %v598_v24, 0.0  ;;  %365 = vrsqrt.f32 %v596_v20  ;;  %vm166_vm3 = vcmp.eq.f32.partialorder %v601_v26, inf }
  0xa6   :  { %v79_v27 = vpop.xlane.xlu1 %78  ;;  %v76_v30 = vpop.xlane.xlu0 %75  ;;  %v132_v42 = vsel %vm131_vm8, %v581_v54, %v130_v25  ;;  %367 = vrsqrt.f32 %v601_v26  ;;  %v141_v54 = vand.u32 2147483648, %v584_v58  ;;  %vm161_vm4 = vcmp.eq.f32.partialorder %v592_v5, 0.0 }
  0xa7   :  { %v118_v32 = vsel %vm117_vm5, %v93_v55, %v116_v18  ;;  %v358_v33 = vpop.eup %357  ;;  %v620_v51 = vsel %vm133_vm9, %v134_v48, %v132_v42  ;;  %v625_v56 = vmax.f32 %v79_v27, 1e-24  ;;  %v627_v57 = vmax.f32 %v76_v30, 1e-24 }
  0xa8   :  { %v604_v36 = vsel %vm119_vm6, %v120_v19, %v118_v32  ;;  %v137_v44 = vmul.f32 %v358_v33, %v584_v58  ;;  %v360_v47 = vpop.eup %359  ;;  %v226_v4 = vsel %vm220_vm2, %v620_v51, 0.0  ;;  %v148_v19 = vand.u32 2147483648, %v586_v59 }
  0xa9   :  { %v222_v39 = vsel %vm220_vm2, %v604_v36, 0.0  ;;  %v144_v53 = vmul.f32 %v360_v47, %v586_v59  ;;  %369 = vrsqrt.f32 %v625_v56  ;;  %v155_v30 = vand.u32 2147483648, %v589_v63 }
  0xaa   :  { %v223_v43 = vadd.f32 %v222_v39, %v221_v38  ;;  %v85_v45 = vpop.xlane.xlu1 %84  ;;  %v82_v46 = vpop.xlane.xlu0 %81  ;;  %v139_v55 = vsel %vm138_vm10, %v584_v58, %v137_v44  ;;  %371 = vrsqrt.f32 %v627_v57  ;;  %v162_v42 = vand.u32 2147483648, %v592_v5 }
  0xab   :  { %v362_v50 = vpop.eup %361  ;;  %v632_v62 = vmax.f32 %v85_v45, 1e-24  ;;  %v638_v10 = vmax.f32 %v82_v46, 1e-24  ;;  %v641_v12 = vsel %vm140_vm12, %v141_v54, %v139_v55  ;;  %v146_v58 = vsel %vm145_vm11, %v586_v59, %v144_v53 }
  0xac   :  { %v225_v52 = vadd.f32 %v224_v49, %v223_v43  ;;  %v364_v61 = vpop.eup %363  ;;  %v151_v7 = vmul.f32 %v362_v50, %v589_v63  ;;  %v228_v25 = vsel %vm220_vm2, %v641_v12, 0.0  ;;  %v661_v31 = vsel %vm147_vm13, %v148_v19, %v146_v58 }
  0xad   :  { %v158_v14 = vmul.f32 %v364_v61, %v592_v5  ;;  %373 = vrsqrt.f32 %v632_v62  ;;  %v230_v59 = vsel %vm220_vm2, %v661_v31, 0.0  ;;  %vm173_vm5 = vcmp.eq.f32.partialorder %v596_v20, inf }
  0xae   :  { %v91_v60 = vpop.xlane.xlu1 %90  ;;  %v88_v3 = vpop.xlane.xlu0 %87  ;;  %v227_v11 = vadd.f32 %v226_v4, %v225_v52  ;;  %v153_v27 = vsel %vm152_vm15, %v589_v63, %v151_v7  ;;  %375 = vrsqrt.f32 %v638_v10  ;;  %v176_v63 = vand.u32 2147483648, %v596_v20 }
  0xaf   :  { %v643_v13 = vmax.f32 %v91_v60, 1e-24  ;;  %v648_v15 = vmax.f32 %v88_v3, 1e-24  ;;  %v366_v18 = vpop.eup %365  ;;  %v160_v38 = vsel %vm159_vm14, %v592_v5, %v158_v14  ;;  %v670_v43 = vsel %vm154_vm1, %v155_v30, %v153_v27 }
  0xb0   :  { %v368_v21 = vpop.eup %367  ;;  %v229_v32 = vadd.f32 %v228_v25, %v227_v11  ;;  %v172_v39 = vmul.f32 %v366_v18, %v596_v20  ;;  %v169_v45 = vand.u32 2147483648, %v601_v26  ;;  %v680_v46 = vsel %vm161_vm4, %v162_v42, %v160_v38 }
  0xb1   :  { %v165_v33 = vmul.f32 %v368_v21, %v601_v26  ;;  %377 = vrsqrt.f32 %v643_v13  ;;  %vm168_vm6 = vcmp.eq.f32.partialorder %v601_v26, 0.0  ;;  %vm175_vm7 = vcmp.eq.f32.partialorder %v596_v20, 0.0 }
  0xb2   :  { %379 = vrsqrt.f32 %v648_v15  ;;  %v231_v47 = vadd.f32 %v230_v59, %v229_v32  ;;  %v174_v49 = vsel %vm173_vm5, %v596_v20, %v172_v39  ;;  %v232_v5 = vsel %vm220_vm2, %v670_v43, 0.0 }
  0xb3   :  { %v167_v44 = vsel %vm166_vm3, %v601_v26, %v165_v33  ;;  %v370_v48 = vpop.eup %369  ;;  %vm180_vm8 = vcmp.eq.f32.partialorder %v627_v57, inf  ;;  %vm182_vm9 = vcmp.eq.f32.partialorder %v627_v57, 0.0  ;;  %v183_v60 = vand.u32 2147483648, %v627_v57 }
  0xb4   :  { %v687_v50 = vsel %vm168_vm6, %v169_v45, %v167_v44  ;;  %v186_v52 = vmul.f32 %v370_v48, %v625_v56  ;;  %v233_v53 = vadd.f32 %v232_v5, %v231_v47  ;;  %v372_v55 = vpop.eup %371  ;;  %vm187_vm10 = vcmp.eq.f32.partialorder %v625_v56, inf }
  0xb5   :  { %v234_v20 = vsel %vm220_vm2, %v680_v46, 0.0  ;;  %v179_v61 = vmul.f32 %v372_v55, %v627_v57  ;;  %v697_v54 = vsel %vm175_vm7, %v176_v63, %v174_v49  ;;  %vm189_vm11 = vcmp.eq.f32.partialorder %v625_v56, 0.0 }
  0xb6   :  { %v235_v3 = vadd.f32 %v234_v20, %v233_v53  ;;  %v188_v7 = vsel %vm187_vm10, %v625_v56, %v186_v52  ;;  %v190_v11 = vand.u32 2147483648, %v625_v56  ;;  %v236_v14 = vsel %vm220_vm2, %v687_v50, 0.0 }
  0xb7   :  { %v374_v26 = vpop.eup %373  ;;  %v181_v19 = vsel %vm180_vm8, %v627_v57, %v179_v61  ;;  %vm194_vm12 = vcmp.eq.f32.partialorder %v638_v10, inf  ;;  %v197_v32 = vand.u32 2147483648, %v638_v10  ;;  %vm201_vm13 = vcmp.eq.f32.partialorder %v632_v62, inf }
  0xb8   :  { %v376_v4 = vpop.eup %375  ;;  %v200_v58 = vmul.f32 %v374_v26, %v632_v62  ;;  %v237_v25 = vadd.f32 %v236_v14, %v235_v3  ;;  %v184_v30 = vsel %vm182_vm9, %v183_v60, %v181_v19  ;;  %v238_v33 = vsel %vm220_vm2, %v697_v54, 0.0 }
  0xb9   :  { %v193_v21 = vmul.f32 %v376_v4, %v638_v10  ;;  %v191_v38 = vsel %vm189_vm11, %v190_v11, %v188_v7  ;;  %vm196_vm14 = vcmp.eq.f32.partialorder %v638_v10, 0.0  ;;  %v240_v63 = vsel %vm220_vm2, %v184_v30, 0.0 }
  0xba   :  { %v239_v59 = vadd.f32 %v238_v33, %v237_v25  ;;  %v202_v57 = vsel %vm201_vm13, %v632_v62, %v200_v58  ;;  %v204_v47 = vand.u32 2147483648, %v632_v62  ;;  %vm208_vm15 = vcmp.eq.f32.partialorder %v648_v15, inf }
  0xbb   :  { %v378_v18 = vpop.eup %377  ;;  %v195_v39 = vsel %vm194_vm12, %v638_v10, %v193_v21  ;;  %vm203_vm1 = vcmp.eq.f32.partialorder %v632_v62, 0.0  ;;  %v242_v49 = vsel %vm220_vm2, %v191_v38, 0.0  ;;  %v211_v10 = vand.u32 2147483648, %v648_v15 }
  0xbc   :  { %v380_v27 = vpop.eup %379  ;;  %v214_v44 = vmul.f32 %v378_v18, %v643_v13  ;;  %v198_v45 = vsel %vm196_vm14, %v197_v32, %v195_v39  ;;  %v241_v56 = vadd.f32 %v240_v63, %v239_v59  ;;  %v205_v5 = vsel %vm203_vm1, %v204_v47, %v202_v57 }
  0xbd   :  { %v207_v42 = vmul.f32 %v380_v27, %v648_v15  ;;  %vm215_vm3 = vcmp.eq.f32.partialorder %v643_v13, inf  ;;  %vm210_vm4 = vcmp.eq.f32.partialorder %v648_v15, 0.0  ;;  %v244_v55 = vsel %vm220_vm2, %v198_v45, 0.0 }
  0xbe   :  { %v243_v52 = vadd.f32 %v242_v49, %v241_v56  ;;  %v216_v53 = vsel %vm215_vm3, %v643_v13, %v214_v44  ;;  %v218_v20 = vand.u32 2147483648, %v643_v13  ;;  %vm217_vm5 = vcmp.eq.f32.partialorder %v643_v13, 0.0 }
  0xbf   :  { %v209_v48 = vsel %vm208_vm15, %v648_v15, %v207_v42  ;;  %v246_v26 = vsel %vm220_vm2, %v205_v5, 0.0  ;;  %381 = vrcp.f32 %v606_v37 }
  0xc0   :  { %v212_v60 = vsel %vm210_vm4, %v211_v10, %v209_v48  ;;  %v245_v62 = vadd.f32 %v244_v55, %v243_v52  ;;  %v219_v61 = vsel %vm217_vm5, %v218_v20, %v216_v53  ;;  %383 = vrcp.f32 %v598_v24 }
  0xc1   :  { %v248_v4 = vsel %vm220_vm2, %v212_v60, 0.0  ;;  %v250_v11 = vsel %vm220_vm2, %v219_v61, 0.0  ;;  %385 = vrcp.f32 %v620_v51 }
  0xc2   :  { %v247_v3 = vadd.f32 %v246_v26, %v245_v62  ;;  %387 = vrcp.f32 %v604_v36 }
  0xc3   :  { %389 = vrcp.f32 %v661_v31 }
  0xc4   :  { %v249_v7 = vadd.f32 %v248_v4, %v247_v3  ;;  %391 = vrcp.f32 %v641_v12 }
  0xc5   :  { %393 = vrcp.f32 %v670_v43 }
  0xc6   :  { %v251_v15 = vadd.f32 %v250_v11, %v249_v7  ;;  %395 = vrcp.f32 %v680_v46 }
  0xc7   :  { %397 = vrcp.f32 %v687_v50 }
  0xc8   :  { %252 = vadd.xlane.f32.xlu0 %v251_v15  ;;  %399 = vrcp.f32 %v697_v54 }
  0xc9   :  { %v382_v13 = vpop.eup %381  ;;  %401 = vrcp.f32 %v191_v38 }
  0xca   :  { %v384_v37 = vpop.eup %383  ;;  %403 = vrcp.f32 %v184_v30 }
  0xcb   :  { %v386_v24 = vpop.eup %385  ;;  %405 = vrcp.f32 %v198_v45 }
  0xcc   :  { %v388_v51 = vpop.eup %387  ;;  %407 = vrcp.f32 %v205_v5 }
  0xcd   :  { %v390_v36 = vpop.eup %389  ;;  %409 = vrcp.f32 %v212_v60 }
  0xce   :  { %v392_v31 = vpop.eup %391  ;;  %411 = vrcp.f32 %v219_v61 }
  0xcf   :  { %v394_v12 = vpop.eup %393 }
  0xd0   :  { %v396_v43 = vpop.eup %395 }
  0xd1   :  { %v398_v32 = vpop.eup %397 }
  0xd2   :  { %v400_v46 = vpop.eup %399 }
  0xd3   :  { %v402_v50 = vpop.eup %401 }
  0xd4   :  { %v404_v54 = vpop.eup %403 }
  0xd5   :  { %v406_v30 = vpop.eup %405 }
  0xd6   :  { %v408_v38 = vpop.eup %407 }
  0xd7   :  { %v410_v44 = vpop.eup %409 }
 0x155   :  { %v253_v58 = vpop.xlane.xlu0 %252 }
 0x156   :  { %v254_v14 = vrot.slane %v253_v58, 4 }
 0x158   :  { %v255_v18 = vadd.f32 %v254_v14, %v253_v58 }
 0x15a   :  { %v256_v19 = vrot.slane %v255_v18, 2 }
 0x15c   :  { %v257_v21 = vadd.f32 %v256_v19, %v255_v18 }
 0x15e   :  { %v258_v25 = vrot.slane %v257_v21, 1 }
 0x160   :  { %v259_v27 = vadd.f32 %v258_v25, %v257_v21 }
 0x162   :  { %346 = vpush %v259_v27 }
 0x193   :  { %s347_s14 = spop %346 }
 0x194   :  { %s261_s15 = smul.f32 0.0078125, %s347_s14 }
 0x196   :  { %v262_v33 = vstv %s261_s15 }
 0x197   :  { %v264_v39 = vmul.f32 %v384_v37, %v262_v33  ;;  %v266_v42 = vmul.f32 %v388_v51, %v262_v33  ;;  %v268_v59 = vmul.f32 %v382_v13, %v262_v33  ;;  %v270_v57 = vmul.f32 %v386_v24, %v262_v33  ;;  %327 = vst [vmem:[#allocation2] sm:$0xff] %v262_v33 }
 0x198   :  { %v272_v63 = vmul.f32 %v392_v31, %v262_v33  ;;  %v274_v45 = vmul.f32 %v390_v36, %v262_v33  ;;  %v276_v47 = vmul.f32 %v394_v12, %v262_v33  ;;  %v278_v56 = vmul.f32 %v396_v43, %v262_v33 }
 0x199   :  { %424 = shalt.err (!%p421_p4)
}
 0x19a   :  { %s425_s19 = scalar_lea.hbm %s843_s2, 128 }
 0x19b   :  { %p426_p5 = scmp.ne.s32.totalorder %s843_s2, %s425_s19  ;;  %p429_p6 = scmp.lt.u32.totalorder %s425_s19, %s843_s2 }
 0x19d   :  { %p431_p7 = pnand %p429_p6, %p426_p5 }
 0x19f   :  { %434 = shalt.err (!%p431_p7)
}
 0x1a0   :  { %339 = dma.vmem_to_hbm [thread:$0]  %s337_s13, 128, %s843_s2, [#allocation3]   ;;  %v412_v48 = vpop.eup %411  ;;  %v280_v49 = vmul.f32 %v398_v32, %v262_v33  ;;  %v282_v5 = vmul.f32 %v400_v46, %v262_v33  ;;  %v284_v10 = vmul.f32 %v404_v54, %v262_v33  ;;  %v286_v52 = vmul.f32 %v402_v50, %v262_v33 }
 0x1a1   :  { %v288_v53 = vmul.f32 %v406_v30, %v262_v33  ;;  %v290_v55 = vmul.f32 %v408_v38, %v262_v33  ;;  %v292_v60 = vmul.f32 %v410_v44, %v262_v33  ;;  %v294_v20 = vmul.f32 %v412_v48, %v262_v33 }
 0x1a2   :  { %v295_v62 = vmul.f32 %v264_v39, %v461_v1  ;;  %v296_v26 = vmul.f32 %v266_v42, %v477_v6  ;;  %v297_v61 = vmul.f32 %v268_v59, %v456_v0  ;;  %v298_v3 = vmul.f32 %v270_v57, %v466_v2 }
 0x1a3   :  { %v299_v4 = vmul.f32 %v272_v63, %v489_v9  ;;  %v300_v7 = vmul.f32 %v274_v45, %v484_v8  ;;  %v301_v11 = vmul.f32 %v276_v47, %v507_v17  ;;  %v302_v15 = vmul.f32 %v278_v56, %v502_v16 }
 0x1a4   :  { %v303_v58 = vmul.f32 %v280_v49, %v523_v23  ;;  %v304_v14 = vmul.f32 %v282_v5, %v518_v22  ;;  %v305_v1 = vmul.f32 %v284_v10, %v539_v29  ;;  %v306_v6 = vmul.f32 %v286_v52, %v534_v28  ;;  %311 = vst.msk [vmem:[%s842_s1] sm:$0xff] %vm43_vm0, %v295_v62 }
 0x1a5   :  { %312 = vst.msk [vmem:[%s842_s1 + $0x8] sm:$0xff] %vm43_vm0, %v296_v26  ;;  %313 = vst.msk [vmem:[%s842_s1 + $0x10] sm:$0xff] %vm43_vm0, %v297_v61  ;;  %v307_v0 = vmul.f32 %v288_v53, %v555_v35  ;;  %v308_v2 = vmul.f32 %v290_v55, %v550_v34  ;;  %v309_v8 = vmul.f32 %v292_v60, %v571_v41 }
 0x1a6   :  { %314 = vst.msk [vmem:[%s842_s1 + $0x18] sm:$0xff] %vm43_vm0, %v298_v3  ;;  %v310_v9 = vmul.f32 %v294_v20, %v566_v40  ;;  %315 = vst.msk [vmem:[%s842_s1 + $0x20] sm:$0xff] %vm43_vm0, %v299_v4 }
 0x1a7   :  { %316 = vst.msk [vmem:[%s842_s1 + $0x28] sm:$0xff] %vm43_vm0, %v300_v7  ;;  %317 = vst.msk [vmem:[%s842_s1 + $0x30] sm:$0xff] %vm43_vm0, %v301_v11 }
 0x1a8   :  { %318 = vst.msk [vmem:[%s842_s1 + $0x38] sm:$0xff] %vm43_vm0, %v302_v15  ;;  %319 = vst.msk [vmem:[%s842_s1 + $0x40] sm:$0xff] %vm43_vm0, %v303_v58 }
 0x1a9   :  { %320 = vst.msk [vmem:[%s842_s1 + $0x48] sm:$0xff] %vm43_vm0, %v304_v14  ;;  %321 = vst.msk [vmem:[%s842_s1 + $0x50] sm:$0xff] %vm43_vm0, %v305_v1 }
 0x1aa   :  { %322 = vst.msk [vmem:[%s842_s1 + $0x58] sm:$0xff] %vm43_vm0, %v306_v6  ;;  %323 = vst.msk [vmem:[%s842_s1 + $0x60] sm:$0xff] %vm43_vm0, %v307_v0 }
 0x1ab   :  { %324 = vst.msk [vmem:[%s842_s1 + $0x68] sm:$0xff] %vm43_vm0, %v308_v2  ;;  %325 = vst.msk [vmem:[%s842_s1 + $0x70] sm:$0xff] %vm43_vm0, %v309_v8 }
 0x1ac   :  { %326 = vst.msk [vmem:[%s842_s1 + $0x78] sm:$0xff] %vm43_vm0, %v310_v9 }
 0x1ad   :  { %435 = dma.done.wait [#allocation3], 128  }
 0x1ae   :  { %436 = vsyncadd [#allocation3], 4294967168 }
 0x1af   :  { %345 = vsyncpa [#allocation3], 1 }

</bundles_post_ra>
